<compile_context>
chip_gen: v7x
topology: tpu7x:2x2x1
jax: 0.10.0
libtpu: 0.0.40
codegen_flags: <defaults>
</compile_context>

<pallas_src>
import functools

import jax
import jax.numpy as jnp
from jax.experimental import pallas as pl
from jax.experimental.pallas import tpu as pltpu


_SMALL_K = 8  # contraction dims <= this run on the VPU instead of the MXU


def _round_up(x, m):
    return ((x + m - 1) // m) * m


def _chip_info():
    """(num_tensorcores, lane_alignment) inferred from the device kind.

    Only a perf heuristic (tile sizing) - correctness never depends on it.
    """
    try:
        kind = jax.devices()[0].device_kind.lower()
    except Exception:
        return 1, 256
    two_tc = any(t in kind for t in ("v7", "7x", "v4", "v5p"))   # dual TC / megacore
    wide_mxu = any(t in kind for t in ("v6", "v7", "7x"))        # 256-wide MXU
    return (2 if two_tc else 1), (256 if wide_mxu else 128)


def _pick_tile(n, batch_tile, num_tc, align):
    """Lane-aligned batch tile: one tile per TensorCore when the batch is small,
    capped at batch_tile for large batches."""
    batch_tile = max(align, _round_up(batch_tile, align))
    per_core = (n + num_tc - 1) // num_tc
    return min(batch_tile, max(align, _round_up(per_core, align)))


def _build_plan_and_pack(weights, biases, small_k=_SMALL_K):
    """Pack all layer params into one (rows, width) f32 slab.

    Pieces are stacked along rows (sublanes), each padded to a multiple of 8 rows,
    so every in-kernel slice is sublane-aligned. Returns a static `plan` of
    (path, d_out, d_in, w_row_off, b_row_off) per layer:
      * path == "vpu":  tiny contraction (d_in <= small_k), w stored (d_out, d_in)
      * path == "head": single output row, w stored pre-transposed (d_in, 1)
      * path == "mxu":  regular matmul layer, w stored (d_out, d_in)
    """
    pieces, plan = [], []
    row, width = 0, 1

    def _add(arr):
        nonlocal row
        off = row
        row += _round_up(arr.shape[0], 8)
        pieces.append((off, arr))
        return off

    for w, b in zip(weights, biases):
        w = jnp.asarray(w, jnp.float32)
        b = jnp.asarray(b, jnp.float32).reshape(-1, 1)
        d_out, d_in = w.shape
        if d_in <= small_k:
            path, w_store = "vpu", w
        elif d_out == 1:
            path, w_store = "head", w.T          # (d_in, 1) for the sublane reduction
        else:
            path, w_store = "mxu", w
        width = max(width, w_store.shape[1])
        w_off = _add(w_store)
        b_off = _add(b)
        plan.append((path, d_out, d_in, w_off, b_off))

    padded = []
    for _, arr in pieces:
        r, c = arr.shape
        padded.append(jnp.pad(arr, ((0, _round_up(r, 8) - r), (0, width - c))))
    slab = jnp.concatenate(padded, axis=0)       # (rows, width), a few KB
    return tuple(plan), slab


def _mlp_kernel(x_ref, p_ref, out_ref, *, plan):
    """Fused MLP in (features, batch) layout.

    x_ref: (d_in0, tile) input block, batch on lanes.
    p_ref: packed parameter slab (constant across the grid, resident in VMEM).
    """
    num_layers = len(plan)
    h = x_ref[...]                               # (d_in0, tile)
    t = h.shape[-1]

    for li, (path, d_out, d_in, w_off, b_off) in enumerate(plan):
        b = p_ref[b_off:b_off + d_out, 0:1]      # (d_out, 1), broadcasts along lanes

        if path == "vpu":
            # Tiny contraction (the 2 -> 32 input layer): an MXU matmul would pad
            # K=2 up to 128/256; a couple of broadcast FMAs on the VPU do it with
            # zero padding.
            # NOTE: a stride-0 sublane-broadcast load (x_ref[pl.ds(k, d_out,
            # stride=0), :]) would move the row broadcast onto the vld slot, but
            # pl.ds requires stride >= 1, so the broadcast stays on the value.
            acc = jnp.broadcast_to(b, (d_out, t))
            for k in range(d_in):
                wk = p_ref[w_off:w_off + d_out, k:k + 1]   # (d_out, 1) lane-bcast
                acc = acc + wk * h[k:k + 1, :]             # (1, t) sublane-bcast
            h = acc
        elif path == "head":
            # Single output row (the 32 -> 1 head): broadcast-multiply + sublane
            # reduction on the XLU instead of a padded MXU matmul. w stored (d_in, 1).
            w = p_ref[w_off:w_off + d_in, 0:1]
            h = jnp.sum(w * h, axis=0, keepdims=True) + b
        else:
            # Regular layer (32x32): MXU. Padded K/M is only a couple of vmatmul
            # passes per tile and is not the binding slot - keep jnp.dot.
            w = p_ref[w_off:w_off + d_out, 0:d_in]
            h = jnp.dot(w, h, preferred_element_type=jnp.float32) + b

        if li < num_layers - 1:
            h = jnp.tanh(h)   # expected to lower to the EUP transcendental slot

    out_ref[...] = h.astype(out_ref.dtype)


@functools.partial(jax.jit, static_argnames=("batch_tile",))
def dnn_forward(x, weights, biases, *, batch_tile=1024):
    """Fused MLP forward.

    x:       (N, D_in) float32                    (torch data layout)
    weights: sequence of (D_out_i, D_in_i) float32 (torch nn.Linear weight layout)
    biases:  sequence of (D_out_i,) float32
    returns  (N, D_out) float32
    """
    x = jnp.asarray(x, jnp.float32)
    n, d_in = x.shape

    plan, slab = _build_plan_and_pack(weights, biases)
    d_out = plan[-1][1]

    num_tc, align = _chip_info()
    tile = _pick_tile(n, batch_tile, num_tc, align)
    grid = (pl.cdiv(n, tile),)

    # No padded copy of the input: the ragged last block is handled by Pallas
    # (garbage columns never reach the (d_out, n) output array). The transpose
    # fuses with surrounding XLA ops because dnn_forward itself is jitted.
    xt = x.T                                     # (d_in, n), batch on lanes

    kernel = functools.partial(_mlp_kernel, plan=plan)

    out_t = pl.pallas_call(
        kernel,
        out_shape=jax.ShapeDtypeStruct((d_out, n), jnp.float32),
        grid_spec=pltpu.PrefetchScalarGridSpec(
            num_scalar_prefetch=0,
            grid=grid,
            in_specs=[
                pl.BlockSpec((d_in, tile), lambda i: (0, i)),
                # One packed param slab, constant index_map -> fetched once,
                # stays resident in VMEM across all grid steps.
                pl.BlockSpec(slab.shape, lambda i: (0, 0)),
            ],
            out_specs=pl.BlockSpec((d_out, tile), lambda i: (0, i)),
        ),
        compiler_params=pltpu.CompilerParams(
            dimension_semantics=("parallel",),
            # Footprint is ~KBs (two (features, tile) f32 buffers + the slab);
            # 32 MiB never binds and is safe on v7x's 64 MiB VMEM.
            vmem_limit_bytes=32 * 1024 * 1024,
        ),
    )(xt, slab)

    return out_t.T                               # (N, D_out)


def dnn_reference(x, weights, biases):
    """Pure-JAX reference (torch nn.Linear semantics) for correctness checking."""
    h = jnp.asarray(x, jnp.float32)
    for li, (w, b) in enumerate(zip(weights, biases)):
        h = h @ w.T + b.reshape(1, -1)
        if li < len(weights) - 1:
            h = jnp.tanh(h)
    return h


def init_params(key, layer_sizes):
    """Xavier-uniform init in torch orientation (mimics DNN.init_weights, gain=1, bias=0)."""
    weights, biases = [], []
    for i in range(len(layer_sizes) - 1):
        fan_in, fan_out = layer_sizes[i], layer_sizes[i + 1]
        key, sub = jax.random.split(key)
        limit = jnp.sqrt(6.0 / (fan_in + fan_out))
        w = jax.random.uniform(
            sub, (fan_out, fan_in), minval=-limit, maxval=limit, dtype=jnp.float32
        )
        b = jnp.zeros((fan_out,), dtype=jnp.float32)
        weights.append(w)
        biases.append(b)
    return weights, biases


if __name__ == "__main__":
    # DNN(args, layers=[2, 32, 32, 1], activation='tanh') -- typical PINN config.
    layer_sizes = [2, 32, 32, 1]

    key = jax.random.PRNGKey(0)
    key, kparam = jax.random.split(key)
    weights, biases = init_params(kparam, layer_sizes)
    weights, biases = tuple(weights), tuple(biases)

    # 1000: ragged batch, exercises the multi-step / ragged-last-block path.
    # 200:  small batch, exercises the single-tile (no forced split) path.
    for batch in (1000, 200):
        key, kx = jax.random.split(key)
        x = jax.random.normal(kx, (batch, layer_sizes[0]), dtype=jnp.float32)

        out = jax.block_until_ready(dnn_forward(x, weights, biases))
        ref = dnn_reference(x, weights, biases)

        assert out.shape == (batch, layer_sizes[-1])
        assert jnp.allclose(out, ref, atol=1e-4, rtol=1e-4), (
            f"mismatch vs reference at batch={batch}"
        )

    print("KERNEL_OK")
</pallas_src>

<mosaic_0001>
module attributes {stable_mosaic.version = 11 : i64} {
  func.func @_mlp_kernel(%arg0: i32, %arg1: memref<2x1024xf32, #tpu.memory_space<vmem>>, %arg2: memref<168x32xf32, #tpu.memory_space<vmem>>, %arg3: memref<1x1024xf32, #tpu.memory_space<vmem>>) attributes {dimension_semantics = [#tpu.dimension_semantics<parallel>], iteration_bounds = array<i64: 1>, scalar_prefetch = 0 : i64, scratch_operands = 0 : i64, tpu.core_type = #tpu.core_type<tc>, window_params = [{transform_indices = @transform_0, window_bounds = array<i64: 2, 1024>}, {pipeline_mode = #tpu.pipeline_mode<synchronous>, transform_indices = @transform_1, window_bounds = array<i64: 168, 32>}, {transform_indices = @transform_2, window_bounds = array<i64: 1, 1024>}]} {
    %c0 = arith.constant 0 : index
    %c0_0 = arith.constant 0 : index
    %0 = vector.load %arg1[%c0, %c0_0] : memref<2x1024xf32, #tpu.memory_space<vmem>>, vector<2x1024xf32>
    %c32 = arith.constant 32 : index
    %c0_1 = arith.constant 0 : index
    %1 = vector.load %arg2[%c32, %c0_1] : memref<168x32xf32, #tpu.memory_space<vmem>>, vector<32x1xf32>
    %2 = vector.shape_cast %1 : vector<32x1xf32> to vector<32x1xf32>
    %3 = vector.broadcast %2 : vector<32x1xf32> to vector<32x1024xf32>
    %c0_2 = arith.constant 0 : index
    %c0_3 = arith.constant 0 : index
    %4 = vector.load %arg2[%c0_2, %c0_3] : memref<168x32xf32, #tpu.memory_space<vmem>>, vector<32x1xf32>
    %5 = vector.extract_strided_slice %0 {offsets = [0, 0], sizes = [1, 1024], strides = [1, 1]} : vector<2x1024xf32> to vector<1x1024xf32>
    %6 = vector.broadcast %4 : vector<32x1xf32> to vector<32x1024xf32>
    %7 = vector.broadcast %5 : vector<1x1024xf32> to vector<32x1024xf32>
    %8 = arith.mulf %6, %7 : vector<32x1024xf32>
    %9 = arith.addf %3, %8 : vector<32x1024xf32>
    %c0_4 = arith.constant 0 : index
    %c1 = arith.constant 1 : index
    %10 = vector.load %arg2[%c0_4, %c1] : memref<168x32xf32, #tpu.memory_space<vmem>>, vector<32x1xf32>
    %11 = vector.extract_strided_slice %0 {offsets = [1, 0], sizes = [1, 1024], strides = [1, 1]} : vector<2x1024xf32> to vector<1x1024xf32>
    %12 = vector.broadcast %10 : vector<32x1xf32> to vector<32x1024xf32>
    %13 = vector.broadcast %11 : vector<1x1024xf32> to vector<32x1024xf32>
    %14 = arith.mulf %12, %13 : vector<32x1024xf32>
    %15 = arith.addf %9, %14 : vector<32x1024xf32>
    %16 = math.tanh %15 : vector<32x1024xf32>
    %c96 = arith.constant 96 : index
    %c0_5 = arith.constant 0 : index
    %17 = vector.load %arg2[%c96, %c0_5] : memref<168x32xf32, #tpu.memory_space<vmem>>, vector<32x1xf32>
    %c64 = arith.constant 64 : index
    %c0_6 = arith.constant 0 : index
    %18 = vector.load %arg2[%c64, %c0_6] : memref<168x32xf32, #tpu.memory_space<vmem>>, vector<32x32xf32>
    %cst = arith.constant dense<0.000000e+00> : vector<32x1024xf32>
    %19 = tpu.matmul %18, %16, %cst {dimension_numbers = #tpu.dot_dimension_numbers<[1], [0], [0], [1], [0, 0, 1, 1], [], []>} : vector<32x32xf32>, vector<32x1024xf32>, vector<32x1024xf32> -> vector<32x1024xf32>
    %20 = vector.broadcast %17 : vector<32x1xf32> to vector<32x1024xf32>
    %21 = arith.addf %19, %20 : vector<32x1024xf32>
    %22 = math.tanh %21 : vector<32x1024xf32>
    %c160 = arith.constant 160 : index
    %c0_7 = arith.constant 0 : index
    %23 = vector.load %arg2[%c160, %c0_7] : memref<168x32xf32, #tpu.memory_space<vmem>>, vector<1x1xf32>
    %c128 = arith.constant 128 : index
    %c0_8 = arith.constant 0 : index
    %24 = vector.load %arg2[%c128, %c0_8] : memref<168x32xf32, #tpu.memory_space<vmem>>, vector<32x1xf32>
    %25 = vector.broadcast %24 : vector<32x1xf32> to vector<32x1024xf32>
    %26 = arith.mulf %25, %22 : vector<32x1024xf32>
    %cst_9 = arith.constant dense<0.000000e+00> : vector<1024xf32>
    %27 = vector.multi_reduction <add>, %26, %cst_9 [0] : vector<32x1024xf32> to vector<1024xf32>
    %28 = vector.shape_cast %27 : vector<1024xf32> to vector<1x1024xf32>
    %29 = vector.broadcast %23 : vector<1x1xf32> to vector<1x1024xf32>
    %30 = arith.addf %28, %29 : vector<1x1024xf32>
    %c0_10 = arith.constant 0 : index
    %c0_11 = arith.constant 0 : index
    %31 = vector.load %arg3[%c0_10, %c0_11] : memref<1x1024xf32, #tpu.memory_space<vmem>>, vector<1x1024xf32>
    tpu.vector_store %arg3[%c0_10, %c0_11], %30 {strides = array<i32>} : memref<1x1024xf32, #tpu.memory_space<vmem>>, vector<1x1024xf32>,
    return
  }
  func.func @transform_0(%arg0: i32) -> (i32, i32) {
    %c0_i32 = arith.constant 0 : i32
    %c0_i32_0 = arith.constant 0 : i32
    return %c0_i32, %arg0 : i32, i32
  }
  func.func @transform_1(%arg0: i32) -> (i32, i32) {
    %c0_i32 = arith.constant 0 : i32
    %c0_i32_0 = arith.constant 0 : i32
    %c0_i32_1 = arith.constant 0 : i32
    return %c0_i32, %c0_i32_0 : i32, i32
  }
  func.func @transform_2(%arg0: i32) -> (i32, i32) {
    %c0_i32 = arith.constant 0 : i32
    %c0_i32_0 = arith.constant 0 : i32
    return %c0_i32, %arg0 : i32, i32
  }
}

</mosaic_0001>

<bundles_post_ra>
// kernel: dnn_forward.1
= control target key start
LH: loop header
LB: loop body
LE: loop exit
PB: predicated region body
PF: predicated region fallthrough
CT: control target
= control target key end

     0   :  { %v1241_v2 = vmov 0   ;;  %s1676_s0 = inlined_call_operand.vmem [shape: f32[2,1000], index: 0, kind: input, shape index: {}]   ;;  %s1677_s1 = inlined_call_operand.vmem [shape: f32[168,32], index: 1, kind: input, shape index: {}]   ;;  %s1678_s2 = inlined_call_operand.hbm [shape: f32[1,1000], index: 2, kind: output, shape index: {}]  }
   0x1   :  { %v38_v0 = vld [vmem:[%s1677_s1] sm:$0xff]  ;;  %1082 = vset.pattern.permute.xlu1 %v1241_v2  ;;  %1081 = vset.pattern.permute.xlu0 %v1241_v2  ;;  %v39_v3 = vld [vmem:[%s1677_s1 + $0x8] sm:$0xff] }
   0x2   :  { %v14_v1 = vld [vmem:[%s1677_s1 + $0x20] sm:$0xff]  ;;  %44 = vperm.xlu0 %1081, %v38_v0   ;;  %v15_v4 = vld [vmem:[%s1677_s1 + $0x28] sm:$0xff] }
   0x3   :  { %20 = vperm.xlu1 %1082, %v14_v1  }
   0x4   :  { %7 = vsyncpa [#allocation3], 0  ;;  %v41_v5 = vld [vmem:[%s1677_s1 + $0x18] sm:$0xff]  ;;  %v1242_v6 = vmov 1   ;;  %v40_v7 = vld [vmem:[%s1677_s1 + $0x10] sm:$0xff]  ;;  %v1243_v10 = vmov 0.0   ;;  %v64_v20 = vlaneseq }
   0x5   :  { %v16_v8 = vld [vmem:[%s1677_s1 + $0x30] sm:$0xff]  ;;  %v17_v9 = vld [vmem:[%s1677_s1 + $0x38] sm:$0xff]  ;;  %489 = vmatprep.mubr.f32.mxu0 %v1243_v10  ;;  %578 = vmatprep.mubr.f32.mxu1 %v1243_v10  ;;  %v384_v11 = vld [vmem:[%s1677_s1 + $0x60] sm:$0xff]  ;;  %vm412_vm0 = vcmask 261120  }
   0x6   :  { %49 = vperm.xlu0 %1081, %v39_v3   ;;  %v385_v12 = vld [vmem:[%s1677_s1 + $0x68] sm:$0xff]  ;;  %v386_v13 = vld [vmem:[%s1677_s1 + $0x70] sm:$0xff]  ;;  %v814_v14 = vld [vmem:[%s1677_s1 + $0x80] sm:$0xff]  ;;  %v1314_v21 = vshrl.u32 %v64_v20, 7 }
   0x7   :  { %25 = vperm.xlu1 %1082, %v15_v4   ;;  %v387_v15 = vld [vmem:[%s1677_s1 + $0x78] sm:$0xff]  ;;  %v816_v16 = vld [vmem:[%s1677_s1 + $0x90] sm:$0xff]  ;;  %v815_v17 = vld [vmem:[%s1677_s1 + $0x88] sm:$0xff] }
   0x8   :  { %v813_v18 = vld [vmem:[%s1677_s1 + $0xa0] sm:$0x1]  ;;  %v817_v19 = vld [vmem:[%s1677_s1 + $0x98] sm:$0xff]  ;;  %v66_v22 = vsub.s32 0, %v1314_v21  ;;  %v74_v23 = vsub.s32 4, %v1314_v21  ;;  %v13_v24 = vld [vmem:[%s1676_s0 + $0x8] sm:$0xff] }
   0x9   :  { %v70_v25 = vsub.s32 2, %v1314_v21  ;;  %v12_v26 = vld [vmem:[%s1676_s0] sm:$0xff]  ;;  %v78_v27 = vsub.s32 6, %v1314_v21  ;;  %v218_v29 = vsub.s32 1, %v1314_v21  ;;  %v226_v30 = vsub.s32 5, %v1314_v21 }
   0xa   :  { %59 = vperm.xlu0 %1081, %v41_v5   ;;  %v83_v28 = vrot.slane %v13_v24, %v66_v22  ;;  %v91_v31 = vrot.slane %v13_v24, %v74_v23  ;;  %v222_v33 = vsub.s32 3, %v1314_v21  ;;  %v230_v34 = vsub.s32 7, %v1314_v21 }
   0xb   :  { %1083 = vset.pattern.permute.xlu1 %v1242_v6  ;;  %v71_v32 = vrot.slane %v12_v26, %v70_v25  ;;  %v79_v35 = vrot.slane %v12_v26, %v78_v27  ;;  %v67_v36 = vrot.slane %v12_v26, %v66_v22  ;;  %v75_v37 = vrot.slane %v12_v26, %v74_v23 }
   0xc   :  { %205 = vperm.xlu1 %1083, %v39_v3   ;;  %v87_v38 = vrot.slane %v13_v24, %v70_v25  ;;  %v1330_v39 = vrot.slane %v83_v28, %v66_v22  ;;  %v235_v40 = vrot.slane %v13_v24, %v218_v29  ;;  %v243_v41 = vrot.slane %v13_v24, %v226_v30 }
   0xd   :  { %v95_v42 = vrot.slane %v13_v24, %v78_v27  ;;  %v1332_v43 = vrot.slane %v91_v31, %v66_v22  ;;  %v1334_v44 = vrot.slane %v71_v32, %v66_v22  ;;  %v223_v45 = vrot.slane %v12_v26, %v222_v33 }
   0xe   :  { %1085 = vset.pattern.permute.xlu0 %v1242_v6  ;;  %v231_v46 = vrot.slane %v12_v26, %v230_v34  ;;  %v1336_v49 = vrot.slane %v79_v35, %v66_v22  ;;  %v1338_v50 = vrot.slane %v67_v36, %v66_v22  ;;  %v219_v51 = vrot.slane %v12_v26, %v218_v29 }
   0xf   :  { %201 = vperm.xlu0 %1085, %v38_v0   ;;  %v1340_v52 = vrot.slane %v75_v37, %v66_v22  ;;  %v227_v53 = vrot.slane %v12_v26, %v226_v30  ;;  %v1342_v54 = vrot.slane %v87_v38, %v66_v22  ;;  %v239_v55 = vrot.slane %v13_v24, %v222_v33 }
  0x10   :  { %1084 = vset.pattern.permute.xlu1 %v1241_v2  ;;  %v247_v56 = vrot.slane %v13_v24, %v230_v34  ;;  %v1345_v58 = vrot.slane %v235_v40, %v218_v29  ;;  %v1347_v59 = vrot.slane %v243_v41, %v218_v29  ;;  %v1349_v60 = vrot.slane %v95_v42, %v66_v22 }
  0x11   :  { %54 = vperm.xlu1 %1084, %v40_v7   ;;  %v1353_v63 = vrot.slane %v223_v45, %v218_v29  ;;  %v1355_v0 = vrot.slane %v231_v46, %v218_v29 }
  0x13   :  { %209 = vperm.xlu0 %1085, %v40_v7   ;;  %v1362_v7 = vrot.slane %v227_v53, %v218_v29 }
  0x15   :  { %30 = vperm.xlu1 %1084, %v16_v8  }
  0x17   :  { %1088 = vset.pattern.permute.xlu0 %v1241_v2 }
  0x18   :  { %399 = vperm.xlu0 %1088, %v385_v12  }
  0x19   :  { %35 = vperm.xlu1 %1084, %v17_v9   ;;  %v1365_v9 = vrot.slane %v239_v55, %v218_v29 }
  0x1c   :  { %820 = vperm.xlu0 %1088, %v814_v14  }
  0x1d   :  { %1086 = vset.pattern.permute.xlu1 %v1242_v6 }
  0x1e   :  { %213 = vperm.xlu1 %1086, %v41_v5   ;;  %v1359_v5 = vrot.slane %v219_v51, %v218_v29 }
  0x20   :  { %830 = vperm.xlu0 %1088, %v816_v16  }
  0x22   :  { %1087 = vset.pattern.permute.xlu1 %v1241_v2 }
  0x23   :  { %394 = vperm.xlu1 %1087, %v384_v11   ;;  %v1367_v11 = vrot.slane %v247_v56, %v218_v29 }
  0x24   :  { %944 = vperm.xlu0 %1088, %v813_v18  }
  0x27   :  { %404 = vperm.xlu1 %1087, %v386_v13  }
  0x2b   :  { %409 = vperm.xlu1 %1087, %v387_v15  }
  0x2f   :  { %825 = vperm.xlu1 %1087, %v815_v17  }
  0x33   :  { %835 = vperm.xlu1 %1087, %v817_v19  }
  0x81   :  { %v45_v47 = vpop.permute.xlu0 %44 }
  0x82   :  { %v21_v48 = vpop.permute.xlu1 %20  ;;  %v140_v57 = vmul.f32 %v1330_v39, %v45_v47  ;;  %v142_v61 = vmul.f32 %v1332_v43, %v45_v47  ;;  %v137_v62 = vmul.f32 %v1334_v44, %v45_v47  ;;  %v139_v3 = vmul.f32 %v1336_v49, %v45_v47 }
  0x83   :  { %v136_v4 = vmul.f32 %v1338_v50, %v45_v47  ;;  %v138_v6 = vmul.f32 %v1340_v52, %v45_v47  ;;  %v141_v8 = vmul.f32 %v1342_v54, %v45_v47  ;;  %v143_v15 = vmul.f32 %v1349_v60, %v45_v47 }
  0x84   :  { %v1369_v12 = vadd.f32 %v140_v57, %v21_v48  ;;  %v1374_v16 = vadd.f32 %v142_v61, %v21_v48  ;;  %v169_v17 = vadd.f32 %v137_v62, %v21_v48  ;;  %v171_v23 = vadd.f32 %v139_v3, %v21_v48 }
  0x85   :  { %v50_v1 = vpop.permute.xlu0 %49  ;;  %v168_v24 = vadd.f32 %v136_v4, %v21_v48  ;;  %v170_v25 = vadd.f32 %v138_v6, %v21_v48  ;;  %v1385_v29 = vadd.f32 %v141_v8, %v21_v48  ;;  %v1396_v45 = vadd.f32 %v143_v15, %v21_v48 }
  0x86   :  { %v26_v2 = vpop.permute.xlu1 %25  ;;  %v145_v13 = vmul.f32 %v1334_v44, %v50_v1  ;;  %v147_v14 = vmul.f32 %v1336_v49, %v50_v1  ;;  %v144_v18 = vmul.f32 %v1338_v50, %v50_v1  ;;  %v146_v19 = vmul.f32 %v1340_v52, %v50_v1 }
  0x87   :  { %v148_v20 = vmul.f32 %v1330_v39, %v50_v1  ;;  %v150_v26 = vmul.f32 %v1332_v43, %v50_v1  ;;  %v149_v28 = vmul.f32 %v1342_v54, %v50_v1  ;;  %v151_v30 = vmul.f32 %v1349_v60, %v50_v1 }
  0x88   :  { %v177_v31 = vadd.f32 %v145_v13, %v26_v2  ;;  %v179_v33 = vadd.f32 %v147_v14, %v26_v2  ;;  %v176_v35 = vadd.f32 %v144_v18, %v26_v2  ;;  %v178_v37 = vadd.f32 %v146_v19, %v26_v2 }
  0x89   :  { %v1379_v22 = vpop.permute.xlu0 %59  ;;  %v180_v40 = vadd.f32 %v148_v20, %v26_v2  ;;  %v182_v46 = vadd.f32 %v150_v26, %v26_v2  ;;  %v1400_v55 = vadd.f32 %v149_v28, %v26_v2  ;;  %v1410_v62 = vadd.f32 %v151_v30, %v26_v2 }
  0x8a   :  { %v1404_v56 = vmul.f32 %v1330_v39, %v1379_v22  ;;  %v1414_v48 = vmul.f32 %v1332_v43, %v1379_v22  ;;  %v161_v3 = vmul.f32 %v1334_v44, %v1379_v22  ;;  %v163_v15 = vmul.f32 %v1336_v49, %v1379_v22 }
  0x8b   :  { %v1382_v27 = vpop.permute.xlu1 %205 }
  0x8c   :  { %v297_v32 = vmul.f32 %v1353_v63, %v1382_v27  ;;  %v299_v34 = vmul.f32 %v1355_v0, %v1382_v27  ;;  %v296_v36 = vmul.f32 %v1359_v5, %v1382_v27  ;;  %v298_v38 = vmul.f32 %v1362_v7, %v1382_v27 }
  0x8d   :  { %v300_v8 = vmul.f32 %v1345_v58, %v1382_v27  ;;  %v302_v26 = vmul.f32 %v1347_v59, %v1382_v27 }
  0x8e   :  { %v329_v41 = vadd.f32 %v297_v32, %v177_v31  ;;  %v331_v42 = vadd.f32 %v299_v34, %v179_v33  ;;  %v1398_v47 = vpop.permute.xlu0 %201  ;;  %v328_v51 = vadd.f32 %v296_v36, %v176_v35  ;;  %v330_v53 = vadd.f32 %v298_v38, %v178_v37 }
  0x8f   :  { %v289_v61 = vmul.f32 %v1353_v63, %v1398_v47  ;;  %v291_v1 = vmul.f32 %v1355_v0, %v1398_v47  ;;  %v288_v6 = vmul.f32 %v1359_v5, %v1398_v47  ;;  %v290_v2 = vmul.f32 %v1362_v7, %v1398_v47 }
  0x90   :  { %v1406_v57 = vpop.permute.xlu1 %54  ;;  %1089 = vtanh.f32 %v329_v41  ;;  %v293_v36 = vmul.f32 %v1365_v9, %v1398_v47  ;;  %v303_v41 = vmul.f32 %v1367_v11, %v1382_v27 }
  0x91   :  { %1091 = vtanh.f32 %v331_v42  ;;  %v321_v4 = vadd.f32 %v289_v61, %v169_v17  ;;  %v323_v14 = vadd.f32 %v291_v1, %v171_v23  ;;  %v320_v17 = vadd.f32 %v288_v6, %v168_v24 }
  0x92   :  { %1093 = vtanh.f32 %v328_v51  ;;  %v1426_v13 = vpop.permute.xlu0 %209  ;;  %v153_v19 = vmul.f32 %v1334_v44, %v1406_v57  ;;  %v155_v20 = vmul.f32 %v1336_v49, %v1406_v57  ;;  %v322_v28 = vadd.f32 %v290_v2, %v170_v25 }
  0x93   :  { %1095 = vtanh.f32 %v330_v53  ;;  %v160_v23 = vmul.f32 %v1338_v50, %v1379_v22  ;;  %v305_v24 = vmul.f32 %v1353_v63, %v1426_v13  ;;  %v307_v44 = vmul.f32 %v1355_v0, %v1426_v13 }
  0x94   :  { %v1430_v18 = vpop.permute.xlu1 %30  ;;  %1097 = vtanh.f32 %v321_v4  ;;  %v162_v49 = vmul.f32 %v1340_v52, %v1379_v22  ;;  %v301_v25 = vmul.f32 %v1365_v9, %v1382_v27  ;;  %v152_v34 = vmul.f32 %v1338_v50, %v1406_v57 }
  0x95   :  { %1099 = vtanh.f32 %v323_v14  ;;  %v185_v30 = vadd.f32 %v153_v19, %v1430_v18  ;;  %v187_v31 = vadd.f32 %v155_v20, %v1430_v18  ;;  %v304_v35 = vmul.f32 %v1359_v5, %v1426_v13 }
  0x96   :  { %1101 = vtanh.f32 %v320_v17  ;;  %v154_v37 = vmul.f32 %v1340_v52, %v1406_v57  ;;  %v306_v38 = vmul.f32 %v1362_v7, %v1426_v13  ;;  %v1464_v42 = vadd.f32 %v300_v8, %v180_v40 }
  0x97   :  { %1103 = vtanh.f32 %v322_v28  ;;  %v337_v33 = vadd.f32 %v305_v24, %v185_v30  ;;  %v292_v50 = vmul.f32 %v1345_v58, %v1398_v47  ;;  %v339_v53 = vadd.f32 %v307_v44, %v187_v31 }
  0x98   :  { %v1450_v32 = vpop.permute.xlu1 %35  ;;  %v184_v61 = vadd.f32 %v152_v34, %v1430_v18  ;;  %v1469_v1 = vadd.f32 %v302_v26, %v182_v46  ;;  %v294_v52 = vmul.f32 %v1347_v59, %v1398_v47  ;;  %v186_v2 = vadd.f32 %v154_v37, %v1430_v18 }
  0x99   :  { %v193_v6 = vadd.f32 %v161_v3, %v1450_v32  ;;  %v325_v27 = vadd.f32 %v293_v36, %v1385_v29  ;;  %1105 = vtanh.f32 %v337_v33  ;;  %v195_v8 = vadd.f32 %v163_v15, %v1450_v32 }
  0x9a   :  { %v1090_v51 = vpop.eup %1089  ;;  %v192_v14 = vadd.f32 %v160_v23, %v1450_v32  ;;  %v336_v17 = vadd.f32 %v304_v35, %v184_v61  ;;  %1107 = vtanh.f32 %v339_v53  ;;  %v194_v20 = vadd.f32 %v162_v49, %v1450_v32 }
  0x9b   :  { %v1092_v4 = vpop.eup %1091  ;;  %v338_v26 = vadd.f32 %v306_v38, %v186_v2  ;;  %v333_v3 = vadd.f32 %v301_v25, %v1400_v55  ;;  %1109 = vtanh.f32 %v325_v27  ;;  %v295_v15 = vmul.f32 %v1367_v11, %v1398_v47 }
  0x9c   :  { %v1094_v40 = vpop.eup %1093  ;;  %1111 = vtanh.f32 %v336_v17  ;;  %v157_v36 = vmul.f32 %v1342_v54, %v1406_v57  ;;  %v335_v37 = vadd.f32 %v303_v41, %v1410_v62  ;;  %v324_v38 = vadd.f32 %v292_v50, %v1369_v12 }
  0x9d   :  { %v1096_v19 = vpop.eup %1095  ;;  %v1478_v46 = vpop.permute.xlu1 %213  ;;  %1113 = vtanh.f32 %v338_v26  ;;  %v309_v53 = vmul.f32 %v1365_v9, %v1426_v13  ;;  %v158_v61 = vmul.f32 %v1332_v43, %v1406_v57  ;;  %v326_v41 = vadd.f32 %v294_v52, %v1374_v16 }
  0x9e   :  { %v1098_v28 = vpop.eup %1097  ;;  %v313_v29 = vmul.f32 %v1353_v63, %v1478_v46  ;;  %v315_v30 = vmul.f32 %v1355_v0, %v1478_v46  ;;  %v312_v31 = vmul.f32 %v1359_v5, %v1478_v46  ;;  %v314_v55 = vmul.f32 %v1362_v7, %v1478_v46 }
  0x9f   :  { %v1100_v23 = vpop.eup %1099  ;;  %v1044_v24 = vpack.c.bf16 %v1090_v51, %v1098_v28  ;;  %1115 = vtanh.f32 %v333_v3  ;;  %v327_v5 = vadd.f32 %v295_v15, %v1396_v45  ;;  %v156_v7 = vmul.f32 %v1330_v39, %v1406_v57 }
  0xa0   :  { %v1102_v44 = vpop.eup %1101  ;;  %v1052_v49 = vpack.c.bf16 %v1092_v4, %v1100_v23  ;;  %v345_v25 = vadd.f32 %v313_v29, %v193_v6  ;;  %v347_v63 = vadd.f32 %v315_v30, %v195_v8  ;;  %v344_v34 = vadd.f32 %v312_v31, %v192_v14 }
  0xa1   :  { %v1104_v33 = vpop.eup %1103  ;;  %1045 = vmatprep.subr.bf16.mxu0 %v1044_v24  ;;  %v1046_v0 = vpack.c.bf16 %v1094_v40, %v1102_v44  ;;  %v346_v35 = vadd.f32 %v314_v55, %v194_v20  ;;  %v189_v51 = vadd.f32 %v157_v36, %v1430_v18  ;;  %v159_v45 = vmul.f32 %v1349_v60, %v1406_v57 }
  0xa2   :  { %1053 = vmatprep.subr.bf16.mxu1 %v1052_v49  ;;  %v1054_v47 = vpack.c.bf16 %v1096_v19, %v1104_v33  ;;  %1117 = vtanh.f32 %v345_v25  ;;  %v165_v39 = vmul.f32 %v1342_v54, %v1379_v22  ;;  %v317_v12 = vmul.f32 %v1365_v9, %v1478_v46 }
  0xa3   :  { %1047 = vmatpush1.bf16.msra.mxu0 %v1046_v0  ;;  %1119 = vtanh.f32 %v347_v63  ;;  %v1106_v62 = vpop.eup %1105  ;;  %v191_v50 = vadd.f32 %v159_v45, %v1430_v18  ;;  %v311_v4 = vmul.f32 %v1367_v11, %v1426_v13  ;;  %v167_v57 = vmul.f32 %v1349_v60, %v1379_v22  ;;  %v389_v0 = vld [vmem:[%s1677_s1 + $0x48] sm:$0xff] }
  0xa4   :  { %1055 = vmatpush1.bf16.msra.mxu1 %v1054_v47  ;;  %1121 = vtanh.f32 %v344_v34  ;;  %v1108_v6 = vpop.eup %1107  ;;  %v197_v43 = vadd.f32 %v165_v39, %v1450_v32  ;;  %v319_v54 = vmul.f32 %v1367_v11, %v1478_v46  ;;  %v308_v2 = vmul.f32 %v1345_v58, %v1426_v13 }
  0xa5   :  { %1123 = vtanh.f32 %v346_v35  ;;  %v1110_v9 = vpop.eup %1109  ;;  %v188_v16 = vadd.f32 %v156_v7, %v1430_v18  ;;  %v341_v52 = vadd.f32 %v309_v53, %v189_v51  ;;  %v316_v40 = vmul.f32 %v1345_v58, %v1478_v46 }
  0xa6   :  { %1125 = vtanh.f32 %v327_v5  ;;  %v1112_v27 = vpop.eup %1111  ;;  %v349_v8 = vadd.f32 %v317_v12, %v197_v43  ;;  %v199_v60 = vadd.f32 %v167_v57, %v1450_v32  ;;  %v310_v11 = vmul.f32 %v1347_v59, %v1426_v13  ;;  %v391_v12 = vld [vmem:[%s1677_s1 + $0x58] sm:$0xff] }
  0xa7   :  { %1127 = vtanh.f32 %v335_v37  ;;  %v1114_v22 = vpop.eup %1113  ;;  %v190_v14 = vadd.f32 %v158_v61, %v1430_v18  ;;  %v343_v17 = vadd.f32 %v311_v4, %v191_v50  ;;  %v196_v20 = vadd.f32 %v1404_v56, %v1450_v32  ;;  %v390_v37 = vld [vmem:[%s1677_s1 + $0x50] sm:$0xff]  ;;  %v1580_v4 = vpop.permute.xlu0 %399 }
  0xa8   :  { %1129 = vtanh.f32 %v324_v38  ;;  %v318_v58 = vmul.f32 %v1347_v59, %v1478_v46  ;;  %v340_v3 = vadd.f32 %v308_v2, %v188_v16  ;;  %v198_v13 = vadd.f32 %v1414_v48, %v1450_v32  ;;  %v388_v48 = vld [vmem:[%s1677_s1 + $0x40] sm:$0xff]  ;;  %s1245_s1 = smov [#allocation2]  }
  0xa9   :  { %1131 = vtanh.f32 %v1464_v42  ;;  %v1116_v19 = vpop.eup %1115  ;;  %v351_v42 = vadd.f32 %v319_v54, %v199_v60  ;;  %v348_v29 = vadd.f32 %v316_v40, %v196_v20  ;;  %v342_v56 = vadd.f32 %v310_v11, %v190_v14  ;;  %s1020_s26 = sshll.u32 %s1245_s1, 4  ;;  %s1021_s26 = int_to_ptr.vmem [resolvable:$true] %s1020_s26 }
  0xaa   :  { %1133 = vtanh.f32 %v326_v41  ;;  %v1060_v31 = vpack.c.bf16 %v1116_v19, %v1110_v9  ;;  %v1578_v41 = vpop.permute.xlu1 %394  ;;  %s1217_s27 = scalar_lea.vmem %s1021_s26, 128  ;;  %p1222_p1 = scmp.lt.s32.totalorder %s1021_s26, %s1021_s26 }
  0xab   :  { %1135 = vtanh.f32 %v1469_v1  ;;  %v350_v1 = vadd.f32 %v318_v58, %v198_v13  ;;  %p1218_p0 = scmp.ne.s32.totalorder %s1021_s26, %s1217_s27  ;;  %p1223_p2 = scmp.lt.s32.totalorder %s1217_s27, %s1217_s27 }
  0xac   :  { %v1118_v26 = vpop.eup %1117  ;;  %1137 = vtanh.f32 %v341_v52 }
  0xad   :  { %v1120_v28 = vpop.eup %1119  ;;  %v1048_v18 = vpack.c.bf16 %v1118_v26, %v1106_v62  ;;  %1139 = vtanh.f32 %v349_v8  ;;  %p1224_p3 = por %p1223_p2, %p1222_p1 }
  0xae   :  { %v1122_v30 = vpop.eup %1121  ;;  %v1056_v15 = vpack.c.bf16 %v1120_v28, %v1108_v6  ;;  %1141 = vtanh.f32 %v343_v17  ;;  %v1585_v16 = vpop.permute.xlu1 %404 }
  0xaf   :  { %v1124_v23 = vpop.eup %1123  ;;  %1049 = vmatprep.subr.bf16.mxu0 %v1048_v18  ;;  %v1050_v59 = vpack.c.bf16 %v1122_v30, %v1112_v27  ;;  %1143 = vtanh.f32 %v351_v42  ;;  %p1225_p4 = pnand %p1224_p3, %p1218_p0 }
  0xb0   :  { %v1126_v46 = vpop.eup %1125  ;;  %1057 = vmatprep.subr.bf16.mxu1 %v1056_v15  ;;  %v1058_v24 = vpack.c.bf16 %v1124_v23, %v1114_v22  ;;  %1145 = vtanh.f32 %v340_v3 }
  0xb1   :  { %v1128_v55 = vpop.eup %1127  ;;  %1051 = vmatpush1.bf16.msra.mxu0 %v1050_v59  ;;  %1147 = vtanh.f32 %v348_v29  ;;  %v1244_v29 = vmov 1966171168  }
  0xb2   :  { %v1130_v32 = vpop.eup %1129  ;;  %1059 = vmatpush1.bf16.msra.mxu1 %v1058_v24  ;;  %1061 = vmatprep.subr.bf16.mxu0 %v1060_v31  ;;  %v1068_v44 = vpack.c.bf16 %v1128_v55, %v1126_v46  ;;  %1149 = vtanh.f32 %v342_v56  ;;  %v1592_v19 = vpop.permute.xlu1 %409  ;;  %v1598_v30 = vunpack.c.l.s4 %v1244_v29 }
  0xb3   :  { %v1132_v49 = vpop.eup %1131  ;;  %1151 = vtanh.f32 %v350_v1  ;;  %v1603_v55 = vpop.permute.xlu0 %820 }
  0xb4   :  { %v1134_v25 = vpop.eup %1133  ;;  %1069 = vmatprep.subr.bf16.mxu1 %v1068_v44  ;;  %1028 = vmatmul.mubr.msk.f32.vlgmr.msra.gmra.mrb[0].mxu0 %vm412_vm0, %v388_v48  ;;  %v1062_v63 = vpack.c.bf16 %v1132_v49, %v1130_v32 }
  0xb5   :  { %v1136_v33 = vpop.eup %1135  ;;  %1032 = vmatmul.mubr.msk.f32.vlgmr.msra.gmra.mrb[0].mxu1 %vm412_vm0, %v388_v48  ;;  %495 = vmatprep.mubr.f32.mxu0 %v1243_v10 }
  0xb6   :  { %v1138_v34 = vpop.eup %1137  ;;  %1063 = vmatpush1.bf16.msra.mxu0 %v1062_v63  ;;  %v1070_v35 = vpack.c.bf16 %v1136_v33, %v1134_v25  ;;  %584 = vmatprep.mubr.f32.mxu1 %v1243_v10  ;;  %v1606_v44 = vpop.permute.xlu1 %825  ;;  %v969_v63 = vunpack.c.0.s8 %v1598_v30 }
  0xb7   :  { %v1140_v47 = vpop.eup %1139 }
  0xb8   :  { %v1142_v5 = vpop.eup %1141  ;;  %1071 = vmatpush1.bf16.msra.mxu1 %v1070_v35  ;;  %v1064_v36 = vpack.c.bf16 %v1140_v47, %v1138_v34  ;;  %1029 = vmatmul.mubr.msk.f32.gmra.mrb[2].mxu0 %vm412_vm0, %v389_v0 }
  0xb9   :  { %v1144_v7 = vpop.eup %1143  ;;  %1033 = vmatmul.mubr.msk.f32.gmra.mrb[2].mxu1 %vm412_vm0, %v389_v0  ;;  %501 = vmatprep.mubr.f32.mxu0 %v1243_v10 }
  0xba   :  { %v1146_v38 = vpop.eup %1145  ;;  %1065 = vmatprep.subr.bf16.mxu0 %v1064_v36  ;;  %v1072_v51 = vpack.c.bf16 %v1144_v7, %v1142_v5  ;;  %590 = vmatprep.mubr.f32.mxu1 %v1243_v10 }
  0xbb   :  { %v1148_v53 = vpop.eup %1147 }
  0xbc   :  { %v1150_v45 = vpop.eup %1149  ;;  %1073 = vmatprep.subr.bf16.mxu1 %v1072_v51  ;;  %v1066_v61 = vpack.c.bf16 %v1148_v53, %v1146_v38  ;;  %1030 = vmatmul.mubr.msk.f32.gmra.mrb[4].mxu0 %vm412_vm0, %v390_v37 }
  0xbd   :  { %v1152_v39 = vpop.eup %1151  ;;  %1034 = vmatmul.mubr.msk.f32.gmra.mrb[4].mxu1 %vm412_vm0, %v390_v37  ;;  %507 = vmatprep.mubr.f32.mxu0 %v1243_v10 }
  0xbe   :  { %1067 = vmatpush1.bf16.msra.mxu0 %v1066_v61  ;;  %v1074_v62 = vpack.c.bf16 %v1152_v39, %v1150_v45  ;;  %596 = vmatprep.mubr.f32.mxu1 %v1243_v10 }
  0xc0   :  { %1075 = vmatpush1.bf16.msra.mxu1 %v1074_v62  ;;  %1031 = vmatmul.mubr.msk.f32.gmra.mrb[6].mxu0 %vm412_vm0, %v391_v12 }
  0xc1   :  { %1035 = vmatmul.mubr.msk.f32.gmra.mrb[6].mxu1 %vm412_vm0, %v391_v12  ;;  %667 = vmatprep.mubr.f32.mxu0 %v1243_v10 }
  0xc2   :  { %756 = vmatprep.mubr.f32.mxu1 %v1243_v10 }
  0xc4   :  { %1036 = vmatmul.mubr.msk.f32.vlgmr.msra.gmra.mrb[8].mxu0 %vm412_vm0, %v388_v48 }
  0xc5   :  { %1040 = vmatmul.mubr.msk.f32.vlgmr.msra.gmra.mrb[8].mxu1 %vm412_vm0, %v388_v48  ;;  %673 = vmatprep.mubr.f32.mxu0 %v1243_v10 }
  0xc6   :  { %762 = vmatprep.mubr.f32.mxu1 %v1243_v10 }
  0xc8   :  { %1037 = vmatmul.mubr.msk.f32.gmra.mrb[10].mxu0 %vm412_vm0, %v389_v0 }
  0xc9   :  { %1041 = vmatmul.mubr.msk.f32.gmra.mrb[10].mxu1 %vm412_vm0, %v389_v0  ;;  %679 = vmatprep.mubr.f32.mxu0 %v1243_v10 }
  0xca   :  { %768 = vmatprep.mubr.f32.mxu1 %v1243_v10 }
  0xcc   :  { %1038 = vmatmul.mubr.msk.f32.gmra.mrb[12].mxu0 %vm412_vm0, %v390_v37 }
  0xcd   :  { %1042 = vmatmul.mubr.msk.f32.gmra.mrb[12].mxu1 %vm412_vm0, %v390_v37  ;;  %685 = vmatprep.mubr.f32.mxu0 %v1243_v10 }
  0xce   :  { %774 = vmatprep.mubr.f32.mxu1 %v1243_v10 }
  0xd0   :  { %1039 = vmatmul.mubr.msk.f32.gmra.mrb[14].mxu0 %vm412_vm0, %v391_v12 }
  0xd1   :  { %1043 = vmatmul.mubr.msk.f32.gmra.mrb[14].mxu1 %vm412_vm0, %v391_v12  ;;  %v1618_v12 = vpop.permute.xlu0 %830 }
 0x187   :  { %v491_v50 = vpop.f32.mrb[0].mxu0 }
 0x188   :  { %v580_v6 = vpop.f32.mrb[0].mxu1  ;;  %v492_v43 = vadd.f32 %v491_v50, %v1578_v41  ;;  %v493_v57 = vpop.f32.mrb[1].mxu0 }
 0x189   :  { %v581_v54 = vadd.f32 %v580_v6, %v1578_v41  ;;  %v494_v9 = vadd.f32 %v493_v57, %v1578_v41  ;;  %v582_v2 = vpop.f32.mrb[1].mxu1 }
 0x18a   :  { %1153 = vtanh.f32 %v492_v43  ;;  %v583_v10 = vadd.f32 %v582_v2, %v1578_v41 }
 0x18b   :  { %1155 = vtanh.f32 %v581_v54  ;;  %v497_v52 = vpop.f32.mrb[2].mxu0 }
 0x18c   :  { %1157 = vtanh.f32 %v494_v9  ;;  %v498_v27 = vadd.f32 %v497_v52, %v1580_v4  ;;  %v586_v40 = vpop.f32.mrb[2].mxu1  ;;  %v499_v8 = vpop.f32.mrb[3].mxu0 }
 0x18d   :  { %1159 = vtanh.f32 %v583_v10  ;;  %v587_v60 = vadd.f32 %v586_v40, %v1580_v4  ;;  %v500_v22 = vadd.f32 %v499_v8, %v1580_v4  ;;  %v588_v11 = vpop.f32.mrb[3].mxu1 }
 0x18e   :  { %1161 = vtanh.f32 %v498_v27  ;;  %v589_v14 = vadd.f32 %v588_v11, %v1580_v4 }
 0x18f   :  { %1163 = vtanh.f32 %v587_v60  ;;  %v503_v17 = vpop.f32.mrb[4].mxu0 }
 0x190   :  { %1165 = vtanh.f32 %v500_v22  ;;  %v504_v20 = vadd.f32 %v503_v17, %v1585_v16  ;;  %v592_v58 = vpop.f32.mrb[4].mxu1  ;;  %v505_v42 = vpop.f32.mrb[5].mxu0 }
 0x191   :  { %1167 = vtanh.f32 %v589_v14  ;;  %v593_v26 = vadd.f32 %v592_v58, %v1585_v16  ;;  %v506_v3 = vadd.f32 %v505_v42, %v1585_v16  ;;  %v594_v28 = vpop.f32.mrb[5].mxu1 }
 0x192   :  { %1169 = vtanh.f32 %v504_v20  ;;  %v595_v13 = vadd.f32 %v594_v28, %v1585_v16 }
 0x193   :  { %1171 = vtanh.f32 %v593_v26  ;;  %v509_v18 = vpop.f32.mrb[6].mxu0  ;;  %v1630_v26 = vpop.permute.xlu1 %835 }
 0x194   :  { %v1154_v15 = vpop.eup %1153  ;;  %1173 = vtanh.f32 %v506_v3  ;;  %v510_v56 = vadd.f32 %v509_v18, %v1592_v19  ;;  %v598_v23 = vpop.f32.mrb[6].mxu1 }
 0x195   :  { %v511_v59 = vpop.f32.mrb[7].mxu0  ;;  %v1156_v1 = vpop.eup %1155  ;;  %1175 = vtanh.f32 %v595_v13  ;;  %v599_v46 = vadd.f32 %v598_v23, %v1592_v19  ;;  %v838_v0 = vmul.f32 %v1154_v15, %v1603_v55 }
 0x196   :  { %v512_v24 = vadd.f32 %v511_v59, %v1592_v19  ;;  %v600_v31 = vpop.f32.mrb[7].mxu1  ;;  %v1158_v48 = vpop.eup %1157  ;;  %1177 = vtanh.f32 %v510_v56  ;;  %v840_v34 = vmul.f32 %v1156_v1, %v1603_v55 }
 0x197   :  { %v601_v32 = vadd.f32 %v600_v31, %v1592_v19  ;;  %v1160_v49 = vpop.eup %1159  ;;  %1179 = vtanh.f32 %v599_v46  ;;  %v669_v25 = vpop.f32.mrb[8].mxu0  ;;  %v839_v45 = vmul.f32 %v1158_v48, %v1603_v55 }
 0x198   :  { %v1162_v33 = vpop.eup %1161  ;;  %1181 = vtanh.f32 %v512_v24  ;;  %v670_v35 = vadd.f32 %v669_v25, %v1578_v41  ;;  %v758_v47 = vpop.f32.mrb[8].mxu1  ;;  %v841_v50 = vmul.f32 %v1160_v49, %v1603_v55 }
 0x199   :  { %v671_v5 = vpop.f32.mrb[9].mxu0  ;;  %v1164_v36 = vpop.eup %1163  ;;  %1183 = vtanh.f32 %v601_v32  ;;  %v759_v7 = vadd.f32 %v758_v47, %v1578_v41  ;;  %v846_v37 = vmul.f32 %v1162_v33, %v1606_v44 }
 0x19a   :  { %v672_v38 = vadd.f32 %v671_v5, %v1578_v41  ;;  %v760_v51 = vpop.f32.mrb[9].mxu1  ;;  %v1166_v53 = vpop.eup %1165  ;;  %1185 = vtanh.f32 %v670_v35  ;;  %v848_v61 = vmul.f32 %v1164_v36, %v1606_v44 }
 0x19b   :  { %v761_v39 = vadd.f32 %v760_v51, %v1578_v41  ;;  %v1168_v62 = vpop.eup %1167  ;;  %1187 = vtanh.f32 %v759_v7  ;;  %v847_v6 = vmul.f32 %v1166_v53, %v1606_v44  ;;  %v675_v43 = vpop.f32.mrb[10].mxu0  ;;  %v870_v57 = vadd.f32 %v846_v37, %v838_v0 }
 0x19c   :  { %v1170_v54 = vpop.eup %1169  ;;  %v849_v9 = vmul.f32 %v1168_v62, %v1606_v44  ;;  %1189 = vtanh.f32 %v672_v38  ;;  %v676_v2 = vadd.f32 %v675_v43, %v1580_v4  ;;  %v764_v10 = vpop.f32.mrb[10].mxu1  ;;  %v888_v27 = vadd.f32 %v848_v61, %v840_v34 }
 0x19d   :  { %v677_v52 = vpop.f32.mrb[11].mxu0  ;;  %v1172_v41 = vpop.eup %1171  ;;  %1191 = vtanh.f32 %v761_v39  ;;  %v765_v40 = vadd.f32 %v764_v10, %v1580_v4  ;;  %v854_v8 = vmul.f32 %v1170_v54, %v1618_v12  ;;  %v879_v20 = vadd.f32 %v847_v6, %v839_v45 }
 0x19e   :  { %v678_v60 = vadd.f32 %v677_v52, %v1580_v4  ;;  %v766_v22 = vpop.f32.mrb[11].mxu1  ;;  %v1174_v11 = vpop.eup %1173  ;;  %1193 = vtanh.f32 %v676_v2  ;;  %v856_v14 = vmul.f32 %v1172_v41, %v1618_v12  ;;  %v897_v28 = vadd.f32 %v849_v9, %v841_v50 }
 0x19f   :  { %v767_v17 = vadd.f32 %v766_v22, %v1580_v4  ;;  %v1176_v58 = vpop.eup %1175  ;;  %1195 = vtanh.f32 %v765_v40  ;;  %v855_v42 = vmul.f32 %v1174_v11, %v1618_v12  ;;  %v871_v3 = vadd.f32 %v870_v57, %v854_v8  ;;  %v681_v13 = vpop.f32.mrb[12].mxu0 }
 0x1a0   :  { %v1178_v18 = vpop.eup %1177  ;;  %v857_v29 = vmul.f32 %v1176_v58, %v1618_v12  ;;  %1197 = vtanh.f32 %v678_v60  ;;  %v889_v15 = vadd.f32 %v888_v27, %v856_v14  ;;  %v682_v56 = vadd.f32 %v681_v13, %v1585_v16  ;;  %v770_v23 = vpop.f32.mrb[12].mxu1 }
 0x1a1   :  { %v683_v59 = vpop.f32.mrb[13].mxu0  ;;  %v1180_v4 = vpop.eup %1179  ;;  %1199 = vtanh.f32 %v767_v17  ;;  %v862_v1 = vmul.f32 %v1178_v18, %v1630_v26  ;;  %v880_v46 = vadd.f32 %v879_v20, %v855_v42  ;;  %v771_v24 = vadd.f32 %v770_v23, %v1585_v16 }
 0x1a2   :  { %v772_v31 = vpop.f32.mrb[13].mxu1  ;;  %v1182_v48 = vpop.eup %1181  ;;  %v864_v32 = vmul.f32 %v1180_v4, %v1630_v26  ;;  %v898_v49 = vadd.f32 %v897_v28, %v857_v29  ;;  %1201 = vtanh.f32 %v682_v56  ;;  %v684_v25 = vadd.f32 %v683_v59, %v1585_v16 }
 0x1a3   :  { %v1184_v33 = vpop.eup %1183  ;;  %v863_v0 = vmul.f32 %v1182_v48, %v1630_v26  ;;  %v872_v34 = vadd.f32 %v871_v3, %v862_v1  ;;  %1203 = vtanh.f32 %v771_v24  ;;  %v773_v35 = vadd.f32 %v772_v31, %v1585_v16  ;;  %v687_v47 = vpop.f32.mrb[14].mxu0 }
 0x1a4   :  { %v1186_v5 = vpop.eup %1185  ;;  %v865_v36 = vmul.f32 %v1184_v33, %v1630_v26  ;;  %v890_v7 = vadd.f32 %v889_v15, %v864_v32  ;;  %1205 = vtanh.f32 %v684_v25  ;;  %v688_v37 = vadd.f32 %v687_v47, %v1592_v19  ;;  %v776_v38 = vpop.f32.mrb[14].mxu1 }
 0x1a5   :  { %v689_v51 = vpop.f32.mrb[15].mxu0  ;;  %v1188_v53 = vpop.eup %1187  ;;  %v842_v45 = vmul.f32 %v1186_v5, %v1603_v55  ;;  %v873_v61 = vrot.slane %v872_v34, 4  ;;  %v881_v39 = vadd.f32 %v880_v46, %v863_v0  ;;  %1207 = vtanh.f32 %v773_v35 }
 0x1a6   :  { %v778_v62 = vpop.f32.mrb[15].mxu1  ;;  %v1190_v50 = vpop.eup %1189  ;;  %v844_v16 = vmul.f32 %v1188_v53, %v1603_v55  ;;  %v891_v6 = vrot.slane %v890_v7, 4  ;;  %v899_v43 = vadd.f32 %v898_v49, %v865_v36  ;;  %1209 = vtanh.f32 %v688_v37 }
 0x1a7   :  { %v1192_v57 = vpop.eup %1191  ;;  %v843_v54 = vmul.f32 %v1190_v50, %v1603_v55  ;;  %v882_v9 = vrot.slane %v881_v39, 4  ;;  %v777_v2 = vadd.f32 %v776_v38, %v1592_v19  ;;  %v690_v10 = vadd.f32 %v689_v51, %v1592_v19  ;;  %v945_v38 = vpop.permute.xlu0 %944 }
 0x1a8   :  { %v1194_v52 = vpop.eup %1193  ;;  %v845_v27 = vmul.f32 %v1192_v57, %v1603_v55  ;;  %v900_v41 = vrot.slane %v899_v43, 4  ;;  %v779_v40 = vadd.f32 %v778_v62, %v1592_v19  ;;  %v874_v8 = vadd.f32 %v873_v61, %v872_v34 }
 0x1a9   :  { %v1196_v60 = vpop.eup %1195  ;;  %v850_v22 = vmul.f32 %v1194_v52, %v1606_v44  ;;  %1211 = vtanh.f32 %v777_v2  ;;  %v883_v11 = vadd.f32 %v882_v9, %v881_v39  ;;  %v892_v14 = vadd.f32 %v891_v6, %v890_v7 }
 0x1aa   :  { %v1198_v17 = vpop.eup %1197  ;;  %v852_v20 = vmul.f32 %v1196_v60, %v1606_v44  ;;  %1213 = vtanh.f32 %v690_v10  ;;  %v875_v58 = vrot.slane %v874_v8, 2  ;;  %v901_v42 = vadd.f32 %v900_v41, %v899_v43 }
 0x1ab   :  { %v1200_v3 = vpop.eup %1199  ;;  %v906_v28 = vadd.f32 %v850_v22, %v842_v45  ;;  %v851_v55 = vmul.f32 %v1198_v17, %v1606_v44  ;;  %1215 = vtanh.f32 %v779_v40  ;;  %v884_v13 = vrot.slane %v883_v11, 2 }
 0x1ac   :  { %v1202_v19 = vpop.eup %1201  ;;  %v924_v18 = vadd.f32 %v852_v20, %v844_v16  ;;  %v853_v29 = vmul.f32 %v1200_v3, %v1606_v44  ;;  %v876_v15 = vadd.f32 %v875_v58, %v874_v8  ;;  %v893_v56 = vrot.slane %v892_v14, 2 }
 0x1ad   :  { %v1204_v23 = vpop.eup %1203  ;;  %v915_v59 = vadd.f32 %v851_v55, %v843_v54  ;;  %v858_v4 = vmul.f32 %v1202_v19, %v1618_v12  ;;  %v885_v1 = vadd.f32 %v884_v13, %v883_v11  ;;  %v902_v46 = vrot.slane %v901_v42, 2 }
 0x1ae   :  { %v1206_v24 = vpop.eup %1205  ;;  %v933_v31 = vadd.f32 %v853_v29, %v845_v27  ;;  %v860_v48 = vmul.f32 %v1204_v23, %v1618_v12  ;;  %v877_v32 = vrot.slane %v876_v15, 1  ;;  %v894_v49 = vadd.f32 %v893_v56, %v892_v14 }
 0x1af   :  { %v1208_v25 = vpop.eup %1207  ;;  %v907_v33 = vadd.f32 %v906_v28, %v858_v4  ;;  %v859_v0 = vmul.f32 %v1206_v24, %v1618_v12  ;;  %v886_v34 = vrot.slane %v885_v1, 1  ;;  %v903_v44 = vadd.f32 %v902_v46, %v901_v42 }
 0x1b0   :  { %v1210_v35 = vpop.eup %1209  ;;  %v925_v47 = vadd.f32 %v924_v18, %v860_v48  ;;  %v861_v5 = vmul.f32 %v1208_v25, %v1618_v12  ;;  %v878_v36 = vadd.f32 %v877_v32, %v876_v15  ;;  %v895_v7 = vrot.slane %v894_v49, 1 }
 0x1b1   :  { %v916_v37 = vadd.f32 %v915_v59, %v859_v0  ;;  %v866_v51 = vmul.f32 %v1210_v35, %v1630_v26  ;;  %v887_v53 = vadd.f32 %v886_v34, %v885_v1  ;;  %v904_v45 = vrot.slane %v903_v44, 1 }
 0x1b2   :  { %v934_v61 = vadd.f32 %v933_v31, %v861_v5  ;;  %v896_v39 = vadd.f32 %v895_v7, %v894_v49  ;;  %v947_v62 = vadd.f32 %v945_v38, %v878_v36  ;;  %v972_v57 = vsub.s32 %v969_v63, %v1314_v21 }
 0x1b3   :  { %v1212_v50 = vpop.eup %1211  ;;  %v908_v16 = vadd.f32 %v907_v33, %v866_v51  ;;  %v905_v6 = vadd.f32 %v904_v45, %v903_v44  ;;  %v948_v43 = vadd.f32 %v945_v38, %v887_v53 }
 0x1b4   :  { %v1214_v12 = vpop.eup %1213  ;;  %v868_v54 = vmul.f32 %v1212_v50, %v1630_v26  ;;  %v949_v9 = vadd.f32 %v945_v38, %v896_v39 }
 0x1b5   :  { %v1216_v2 = vpop.eup %1215  ;;  %v909_v10 = vrot.slane %v908_v16, 4  ;;  %v867_v52 = vmul.f32 %v1214_v12, %v1630_v26  ;;  %v950_v27 = vadd.f32 %v945_v38, %v905_v6  ;;  %v963_v41 = vcombine.low %v947_v62, %v948_v43 }
 0x1b6   :  { %v926_v40 = vadd.f32 %v925_v47, %v868_v54  ;;  %v869_v8 = vmul.f32 %v1216_v2, %v1630_v26 }
 0x1b7   :  { %v910_v60 = vadd.f32 %v909_v10, %v908_v16  ;;  %v917_v22 = vadd.f32 %v916_v37, %v867_v52  ;;  %v964_v11 = vcombine.low %v949_v9, %v950_v27  ;;  %v973_v14 = vrot.slane %v963_v41, %v972_v57 }
 0x1b8   :  { %v927_v17 = vrot.slane %v926_v40, 4  ;;  %v935_v30 = vadd.f32 %v934_v61, %v869_v8 }
 0x1b9   :  { %v911_v21 = vrot.slane %v910_v60, 2  ;;  %v918_v63 = vrot.slane %v917_v22, 4  ;;  %v980_v20 = vrot.slane %v964_v11, %v972_v57 }
 0x1ba   :  { %v928_v58 = vadd.f32 %v927_v17, %v926_v40  ;;  %v936_v42 = vrot.slane %v935_v30, 4 }
 0x1bb   :  { %v919_v3 = vadd.f32 %v918_v63, %v917_v22  ;;  %v912_v28 = vadd.f32 %v911_v21, %v910_v60  ;;  %v995_v55 = vcombine.low %v973_v14, %v980_v20 }
 0x1bc   :  { %v929_v13 = vrot.slane %v928_v58, 2  ;;  %v937_v19 = vadd.f32 %v936_v42, %v935_v30 }
 0x1bd   :  { %v920_v18 = vrot.slane %v919_v3, 2  ;;  %v913_v29 = vrot.slane %v912_v28, 1  ;;  %v1003_v5 = vrot.slane %v995_v55, %v972_v57 }
 0x1be   :  { %v938_v15 = vrot.slane %v937_v19, 2  ;;  %v930_v26 = vadd.f32 %v929_v13, %v928_v58 }
 0x1bf   :  { %v914_v56 = vadd.f32 %v913_v29, %v912_v28  ;;  %v921_v23 = vadd.f32 %v920_v18, %v919_v3 }
 0x1c0   :  { %v931_v59 = vrot.slane %v930_v26, 1  ;;  %v939_v4 = vadd.f32 %v938_v15, %v937_v19 }
 0x1c1   :  { %v922_v1 = vrot.slane %v921_v23, 1  ;;  %v951_v48 = vadd.f32 %v945_v38, %v914_v56 }
 0x1c2   :  { %v932_v46 = vadd.f32 %v931_v59, %v930_v26  ;;  %v940_v24 = vrot.slane %v939_v4, 1 }
 0x1c3   :  { %v923_v31 = vadd.f32 %v922_v1, %v921_v23 }
 0x1c4   :  { %v941_v32 = vadd.f32 %v940_v24, %v939_v4  ;;  %v953_v49 = vadd.f32 %v945_v38, %v932_v46 }
 0x1c5   :  { %v952_v25 = vadd.f32 %v945_v38, %v923_v31 }
 0x1c6   :  { %v954_v33 = vadd.f32 %v945_v38, %v941_v32 }
 0x1c7   :  { %v965_v0 = vcombine.low %v951_v48, %v952_v25 }
 0x1c8   :  { %v966_v34 = vcombine.low %v953_v49, %v954_v33 }
 0x1c9   :  { %v987_v44 = vrot.slane %v965_v0, %v972_v57 }
 0x1ca   :  { %v994_v35 = vrot.slane %v966_v34, %v972_v57 }
 0x1cc   :  { %v996_v47 = vcombine.low %v987_v44, %v994_v35 }
 0x1ce   :  { %v1010_v36 = vrot.slane %v996_v47, %v972_v57 }
 0x1d0   :  { %v1011_v7 = vcombine.low %v1003_v5, %v1010_v36 }
 0x1d2   :  { %1013 = vst [vmem:[#allocation2] sm:$0xff] %v1011_v7 }
 0x1d3   :  { %1228 = shalt.err (!%p1225_p4)
}
 0x1d4   :  { %s1229_s30 = scalar_lea.hbm %s1678_s2, 128 }
 0x1d5   :  { %p1230_p5 = scmp.ne.s32.totalorder %s1678_s2, %s1229_s30  ;;  %p1233_p6 = scmp.lt.u32.totalorder %s1229_s30, %s1678_s2 }
 0x1d7   :  { %p1235_p7 = pnand %p1233_p6, %p1230_p5 }
 0x1d9   :  { %1238 = shalt.err (!%p1235_p7)
}
 0x1da   :  { %1023 = dma.vmem_to_hbm [thread:$0]  %s1021_s26, 128, %s1678_s2, [#allocation3]  }
 0x1db   :  { %1239 = dma.done.wait [#allocation3], 128  }
 0x1dc   :  { %1240 = vsyncadd [#allocation3], 4294967168 }
 0x1dd   :  { %1027 = vsyncpa [#allocation3], 1 }

</bundles_post_ra>
